<compile_context>
chip_gen: v6e
topology: v6e:2x2x1
jax: 0.10.0
libtpu: 0.0.40
codegen_flags: <defaults>
</compile_context>

<pallas_src>
import jax
import jax.numpy as jnp
from jax.experimental import pallas as pl
from jax.experimental.pallas import tpu as pltpu

_LANE = 128   # lane width: last-dim padding target
_SUB = 8      # sublane: batch padding target (f32)


def _round_up(n, m):
    return ((n + m - 1) // m) * m


def _make_mlp_kernel(n_layers):
    """Fused MLP forward over one (TM, K) activation tile; weights fully resident."""

    def kernel(*refs):
        x_ref = refs[0]
        o_ref = refs[-1]
        wb = refs[1:-1]  # (w1, b1, w2, b2, ..., wn, bn)

        h = x_ref[...]  # native dtype straight into the MXU
        for l in range(n_layers):
            w = wb[2 * l][...]
            b = wb[2 * l + 1][...]
            # f32 accumulation on the MXU; bias + ReLU on the f32 accumulator.
            h = jnp.dot(h, w, preferred_element_type=jnp.float32) + b.astype(jnp.float32)
            if l < n_layers - 1:
                h = jnp.maximum(h, 0.0)
        o_ref[...] = h.astype(o_ref.dtype)

    return kernel


def _choose_tm(pb, pdims):
    """Largest batch tile (multiple of 8, <=512) that keeps activations well under VMEM."""
    budget = 8 * 1024 * 1024  # activation-tile budget (f32, incl. double-buffering slack)
    per_row = max(sum(pdims) * 4 * 3, 1)
    tm = budget // per_row
    tm = max(_SUB, min(512, (tm // _SUB) * _SUB))
    return min(tm, pb)


def fully_connected_network(x, params):
    """params = ((W1, b1), ..., (Wn, bn)); Wi: (in, out), bi: (1, out).  y = relu(...x@W+b...)@Wn+bn."""
    n_layers = len(params)
    batch, in_dim = x.shape
    out_dim = params[-1][0].shape[1]
    dtype = x.dtype

    # --- lane-dense padding of every feature dimension -------------------------------
    dims = [in_dim] + [w.shape[1] for w, _ in params]
    pdims = [_round_up(d, _LANE) for d in dims]

    pb0 = _round_up(batch, _SUB)
    tm = _choose_tm(pb0, pdims)
    pb = _round_up(pb0, tm)
    grid = (pb // tm,)

    x_p = jnp.zeros((pb, pdims[0]), dtype).at[:batch, :in_dim].set(x)

    padded = []
    for (w, b), din_p, dout_p in zip(params, pdims[:-1], pdims[1:]):
        w_p = jnp.zeros((din_p, dout_p), w.dtype).at[: w.shape[0], : w.shape[1]].set(w)
        b2 = b.reshape(1, -1)
        b_p = jnp.zeros((1, dout_p), b.dtype).at[:, : b2.shape[1]].set(b2)
        padded.append((w_p, b_p))

    # --- BlockSpecs: batch-tiled x/out, weights resident across grid steps -----------
    in_specs = [pl.BlockSpec((tm, pdims[0]), lambda i: (i, 0))]
    flat_inputs = [x_p]
    for w_p, b_p in padded:
        in_specs.append(pl.BlockSpec(w_p.shape, lambda i: (0, 0)))
        in_specs.append(pl.BlockSpec(b_p.shape, lambda i: (0, 0)))
        flat_inputs += [w_p, b_p]
    out_specs = pl.BlockSpec((tm, pdims[-1]), lambda i: (i, 0))

    # --- VMEM budget: only raise the scoped limit when the estimate demands it -------
    weight_bytes = sum(w_p.size * w_p.dtype.itemsize + b_p.size * b_p.dtype.itemsize
                       for w_p, b_p in padded)
    tile_bytes = 2 * tm * (pdims[0] + pdims[-1]) * dtype.itemsize          # dbl-buffered x/out
    interm_bytes = 2 * tm * max(pdims) * 4                                  # f32 intermediates
    estimate = weight_bytes + tile_bytes + interm_bytes
    default_scoped = 32 * 1024 * 1024
    vmem_limit = None
    if estimate > default_scoped:
        # TODO(synk): for hidden sizes in the thousands, add a K/N reduction grid axis
        # with a VMEM f32 accumulator instead of just raising the limit.
        vmem_limit = min(int(estimate * 1.25), 64 * 1024 * 1024)

    compiler_params = pltpu.CompilerParams(
        dimension_semantics=("parallel",),   # batch tiles shard across v7x's 2 TCs
        vmem_limit_bytes=vmem_limit,
    )

    out_p = pl.pallas_call(
        _make_mlp_kernel(n_layers),
        out_shape=jax.ShapeDtypeStruct((pb, pdims[-1]), dtype),
        grid=grid,
        in_specs=in_specs,
        out_specs=out_specs,
        compiler_params=compiler_params,
    )(*flat_inputs)

    # slice the lane-dense padded result back to the logical shape
    return out_p[:batch, :out_dim]


def init_params(key, input_dim, output_dim, arch="32-32", dtype=jnp.float32):
    """Deterministic init mirroring nn.Linear's default U(-1/sqrt(fan_in), 1/sqrt(fan_in))."""
    hidden_sizes = [int(h) for h in arch.split("-")]
    dims = [input_dim] + hidden_sizes + [output_dim]
    params = []
    for d_in, d_out in zip(dims[:-1], dims[1:]):
        key, kw, kb = jax.random.split(key, 3)
        bound = 1.0 / (d_in ** 0.5)
        w = jax.random.uniform(kw, (d_in, d_out), dtype, minval=-bound, maxval=bound)
        b = jax.random.uniform(kb, (1, d_out), dtype, minval=-bound, maxval=bound)
        params.append((w, b))
    return tuple(params)


def reference_forward(x, params):
    h = x
    for i, (w, b) in enumerate(params):
        h = h @ w + b
        if i < len(params) - 1:
            h = jnp.maximum(h, 0.0)
    return h


if __name__ == "__main__":
    key = jax.random.PRNGKey(0)
    batch, input_dim, output_dim = 8, 16, 4
    arch = "32-32"

    key, kx = jax.random.split(key)
    x = jax.random.normal(kx, (batch, input_dim), jnp.float32)
    params = init_params(key, input_dim, output_dim, arch)

    out = jax.block_until_ready(fully_connected_network(x, params))
    ref = reference_forward(x, params)

    assert out.shape == (batch, output_dim), out.shape
    assert jnp.allclose(out, ref, atol=1e-5, rtol=1e-5), float(jnp.abs(out - ref).max())
    print("KERNEL_OK")
</pallas_src>

<mosaic_0001>
module attributes {stable_mosaic.version = 11 : i64} {
  func.func @kernel(%arg0: i32, %arg1: memref<8x128xf32, #tpu.memory_space<vmem>>, %arg2: memref<128x128xf32, #tpu.memory_space<vmem>>, %arg3: memref<1x128xf32, #tpu.memory_space<vmem>>, %arg4: memref<128x128xf32, #tpu.memory_space<vmem>>, %arg5: memref<1x128xf32, #tpu.memory_space<vmem>>, %arg6: memref<128x128xf32, #tpu.memory_space<vmem>>, %arg7: memref<1x128xf32, #tpu.memory_space<vmem>>, %arg8: memref<8x128xf32, #tpu.memory_space<vmem>>) attributes {dimension_semantics = [#tpu.dimension_semantics<parallel>], iteration_bounds = array<i64: 1>, scalar_prefetch = 0 : i64, scratch_operands = 0 : i64, tpu.core_type = #tpu.core_type<tc>, window_params = [{transform_indices = @transform_0, window_bounds = array<i64: 8, 128>}, {pipeline_mode = #tpu.pipeline_mode<synchronous>, transform_indices = @transform_1, window_bounds = array<i64: 128, 128>}, {pipeline_mode = #tpu.pipeline_mode<synchronous>, transform_indices = @transform_2, window_bounds = array<i64: 1, 128>}, {pipeline_mode = #tpu.pipeline_mode<synchronous>, transform_indices = @transform_3, window_bounds = array<i64: 128, 128>}, {pipeline_mode = #tpu.pipeline_mode<synchronous>, transform_indices = @transform_4, window_bounds = array<i64: 1, 128>}, {pipeline_mode = #tpu.pipeline_mode<synchronous>, transform_indices = @transform_5, window_bounds = array<i64: 128, 128>}, {pipeline_mode = #tpu.pipeline_mode<synchronous>, transform_indices = @transform_6, window_bounds = array<i64: 1, 128>}, {transform_indices = @transform_7, window_bounds = array<i64: 8, 128>}]} {
    %c0 = arith.constant 0 : index
    %c0_0 = arith.constant 0 : index
    %0 = vector.load %arg1[%c0, %c0_0] : memref<8x128xf32, #tpu.memory_space<vmem>>, vector<8x128xf32>
    %c0_1 = arith.constant 0 : index
    %c0_2 = arith.constant 0 : index
    %1 = vector.load %arg2[%c0_1, %c0_2] : memref<128x128xf32, #tpu.memory_space<vmem>>, vector<128x128xf32>
    %c0_3 = arith.constant 0 : index
    %c0_4 = arith.constant 0 : index
    %2 = vector.load %arg3[%c0_3, %c0_4] : memref<1x128xf32, #tpu.memory_space<vmem>>, vector<1x128xf32>
    %cst = arith.constant dense<0.000000e+00> : vector<8x128xf32>
    %3 = tpu.matmul %0, %1, %cst {dimension_numbers = #tpu.dot_dimension_numbers<[1], [0], [0], [1], [0, 0, 1, 1], [], []>} : vector<8x128xf32>, vector<128x128xf32>, vector<8x128xf32> -> vector<8x128xf32>
    %4 = vector.broadcast %2 : vector<1x128xf32> to vector<8x128xf32>
    %5 = arith.addf %3, %4 : vector<8x128xf32>
    %cst_5 = arith.constant 0.000000e+00 : f32
    %6 = vector.broadcast %cst_5 : f32 to vector<8x128xf32>
    %7 = arith.maximumf %5, %6 : vector<8x128xf32>
    %c0_6 = arith.constant 0 : index
    %c0_7 = arith.constant 0 : index
    %8 = vector.load %arg4[%c0_6, %c0_7] : memref<128x128xf32, #tpu.memory_space<vmem>>, vector<128x128xf32>
    %c0_8 = arith.constant 0 : index
    %c0_9 = arith.constant 0 : index
    %9 = vector.load %arg5[%c0_8, %c0_9] : memref<1x128xf32, #tpu.memory_space<vmem>>, vector<1x128xf32>
    %cst_10 = arith.constant dense<0.000000e+00> : vector<8x128xf32>
    %10 = tpu.matmul %7, %8, %cst_10 {dimension_numbers = #tpu.dot_dimension_numbers<[1], [0], [0], [1], [0, 0, 1, 1], [], []>} : vector<8x128xf32>, vector<128x128xf32>, vector<8x128xf32> -> vector<8x128xf32>
    %11 = vector.broadcast %9 : vector<1x128xf32> to vector<8x128xf32>
    %12 = arith.addf %10, %11 : vector<8x128xf32>
    %cst_11 = arith.constant 0.000000e+00 : f32
    %13 = vector.broadcast %cst_11 : f32 to vector<8x128xf32>
    %14 = arith.maximumf %12, %13 : vector<8x128xf32>
    %c0_12 = arith.constant 0 : index
    %c0_13 = arith.constant 0 : index
    %15 = vector.load %arg6[%c0_12, %c0_13] : memref<128x128xf32, #tpu.memory_space<vmem>>, vector<128x128xf32>
    %c0_14 = arith.constant 0 : index
    %c0_15 = arith.constant 0 : index
    %16 = vector.load %arg7[%c0_14, %c0_15] : memref<1x128xf32, #tpu.memory_space<vmem>>, vector<1x128xf32>
    %cst_16 = arith.constant dense<0.000000e+00> : vector<8x128xf32>
    %17 = tpu.matmul %14, %15, %cst_16 {dimension_numbers = #tpu.dot_dimension_numbers<[1], [0], [0], [1], [0, 0, 1, 1], [], []>} : vector<8x128xf32>, vector<128x128xf32>, vector<8x128xf32> -> vector<8x128xf32>
    %18 = vector.broadcast %16 : vector<1x128xf32> to vector<8x128xf32>
    %19 = arith.addf %17, %18 : vector<8x128xf32>
    %c0_17 = arith.constant 0 : index
    %c0_18 = arith.constant 0 : index
    %20 = vector.load %arg8[%c0_17, %c0_18] : memref<8x128xf32, #tpu.memory_space<vmem>>, vector<8x128xf32>
    tpu.vector_store %arg8[%c0_17, %c0_18], %19 {strides = array<i32>} : memref<8x128xf32, #tpu.memory_space<vmem>>, vector<8x128xf32>,
    return
  }
  func.func @transform_0(%arg0: i32) -> (i32, i32) {
    %c0_i32 = arith.constant 0 : i32
    %c0_i32_0 = arith.constant 0 : i32
    return %arg0, %c0_i32 : i32, i32
  }
  func.func @transform_1(%arg0: i32) -> (i32, i32) {
    %c0_i32 = arith.constant 0 : i32
    %c0_i32_0 = arith.constant 0 : i32
    %c0_i32_1 = arith.constant 0 : i32
    return %c0_i32, %c0_i32_0 : i32, i32
  }
  func.func @transform_2(%arg0: i32) -> (i32, i32) {
    %c0_i32 = arith.constant 0 : i32
    %c0_i32_0 = arith.constant 0 : i32
    %c0_i32_1 = arith.constant 0 : i32
    return %c0_i32, %c0_i32_0 : i32, i32
  }
  func.func @transform_3(%arg0: i32) -> (i32, i32) {
    %c0_i32 = arith.constant 0 : i32
    %c0_i32_0 = arith.constant 0 : i32
    %c0_i32_1 = arith.constant 0 : i32
    return %c0_i32, %c0_i32_0 : i32, i32
  }
  func.func @transform_4(%arg0: i32) -> (i32, i32) {
    %c0_i32 = arith.constant 0 : i32
    %c0_i32_0 = arith.constant 0 : i32
    %c0_i32_1 = arith.constant 0 : i32
    return %c0_i32, %c0_i32_0 : i32, i32
  }
  func.func @transform_5(%arg0: i32) -> (i32, i32) {
    %c0_i32 = arith.constant 0 : i32
    %c0_i32_0 = arith.constant 0 : i32
    %c0_i32_1 = arith.constant 0 : i32
    return %c0_i32, %c0_i32_0 : i32, i32
  }
  func.func @transform_6(%arg0: i32) -> (i32, i32) {
    %c0_i32 = arith.constant 0 : i32
    %c0_i32_0 = arith.constant 0 : i32
    %c0_i32_1 = arith.constant 0 : i32
    return %c0_i32, %c0_i32_0 : i32, i32
  }
  func.func @transform_7(%arg0: i32) -> (i32, i32) {
    %c0_i32 = arith.constant 0 : i32
    %c0_i32_0 = arith.constant 0 : i32
    return %arg0, %c0_i32 : i32, i32
  }
}

</mosaic_0001>

<bundles_post_ra>
// kernel: tpu_custom_call.1
= control target key start
LH: loop header
LB: loop body
LE: loop exit
PB: predicated region body
PF: predicated region fallthrough
CT: control target
= control target key end

     0   :  { %12 = vsyncpa [#allocation3], 0  ;;  %s792_s0 = inlined_call_operand.hbm [shape: f32[8,128], index: 0, kind: input, shape index: {}]   ;;  %s793_s1 = inlined_call_operand.hbm [shape: f32[128,128], index: 1, kind: input, shape index: {}]   ;;  %s794_s2 = inlined_call_operand.vmem [shape: f32[1,128], index: 2, kind: input, shape index: {}]   ;;  %s795_s3 = inlined_call_operand.hbm [shape: f32[128,128], index: 3, kind: input, shape index: {}]   ;;  %s796_s4 = inlined_call_operand.vmem [shape: f32[1,128], index: 4, kind: input, shape index: {}]   ;;  %s797_s5 = inlined_call_operand.hbm [shape: f32[128,128], index: 5, kind: input, shape index: {}]   ;;  %s798_s6 = inlined_call_operand.vmem [shape: f32[1,128], index: 6, kind: input, shape index: {}]   ;;  %s799_s7 = inlined_call_operand.hbm [shape: f32[8,128], index: 7, kind: output, shape index: {}]  }
   0x1   :  { %13 = vsyncpa [#allocation6], 0 }
   0x2   :  { %14 = vsyncpa [#allocation9], 0 }
   0x3   :  { %15 = vsyncpa [#allocation4], 0  ;;  %s656_s24 = smov [#allocation5]  }
   0x4   :  { %s31_s25 = sshll.u32 %s656_s24, 4  ;;  %s32_s25 = int_to_ptr.vmem [resolvable:$true] %s31_s25 }
   0x5   :  { %s556_s26 = scalar_lea.vmem %s32_s25, 2048  ;;  %p561_p1 = scmp.lt.s32.totalorder %s32_s25, %s32_s25 }
   0x6   :  { %p557_p0 = scmp.ne.s32.totalorder %s32_s25, %s556_s26  ;;  %p562_p2 = scmp.lt.s32.totalorder %s556_s26, %s556_s26 }
   0x8   :  { %p563_p3 = por %p562_p2, %p561_p1 }
   0xa   :  { %p564_p4 = pnand %p563_p3, %p557_p0 }
   0xc   :  { %567 = shalt.err (!%p564_p4)
}
   0xd   :  { %s657_s27 = smov 128   ;;  %s658_s28 = smov 8  }
   0xe   :  { %37 = dma.hbm_to_vmem [thread:$0]  %s793_s1, 2048, %s32_s25, [#allocation6], %s657_s27, %s657_s27, %s658_s28  }
   0xf   :  { %s659_s8 = smov [#allocation2]   ;;  %s660_s10 = smov [#allocation7]  }
  0x10   :  { %s22_s9 = sshll.u32 %s659_s8, 4  ;;  %s45_s11 = sshll.u32 %s660_s10, 4  ;;  %s23_s9 = int_to_ptr.vmem [resolvable:$true] %s22_s9  ;;  %s46_s11 = int_to_ptr.vmem [resolvable:$true] %s45_s11 }
  0x11   :  { %s576_s12 = scalar_lea.vmem %s23_s9, 128  ;;  %p581_p6 = scmp.lt.s32.totalorder %s23_s9, %s23_s9 }
  0x12   :  { %p577_p5 = scmp.ne.s32.totalorder %s23_s9, %s576_s12  ;;  %p582_p7 = scmp.lt.s32.totalorder %s576_s12, %s576_s12 }
  0x14   :  { %p583_p8 = por %p582_p7, %p581_p6 }
  0x16   :  { %p584_p9 = pnand %p583_p8, %p577_p5 }
  0x18   :  { %587 = shalt.err (!%p584_p9)
}
  0x19   :  { %25 = dma.hbm_to_vmem [thread:$0]  %s792_s0, 128, %s23_s9, [#allocation3]  }
  0x1a   :  { %s596_s15 = scalar_lea.vmem %s46_s11, 2048  ;;  %p601_p11 = scmp.lt.s32.totalorder %s46_s11, %s46_s11 }
  0x1b   :  { %p597_p10 = scmp.ne.s32.totalorder %s46_s11, %s596_s15  ;;  %p602_p12 = scmp.lt.s32.totalorder %s596_s15, %s596_s15 }
  0x1d   :  { %p603_p13 = por %p602_p12, %p601_p11 }
  0x1f   :  { %p604_p0 = pnand %p603_p13, %p597_p10 }
  0x21   :  { %607 = shalt.err (!%p604_p0)
}
  0x22   :  { %51 = dma.hbm_to_vmem [thread:$0]  %s795_s3, 2048, %s46_s11, [#allocation6], %s657_s27, %s657_s27, %s658_s28  }
  0x23   :  { %s661_s17 = smov [#allocation8]  }
  0x24   :  { %s59_s18 = sshll.u32 %s661_s17, 4  ;;  %s60_s18 = int_to_ptr.vmem [resolvable:$true] %s59_s18 }
  0x25   :  { %s616_s19 = scalar_lea.vmem %s60_s18, 2048  ;;  %p621_p2 = scmp.lt.s32.totalorder %s60_s18, %s60_s18 }
  0x26   :  { %p617_p1 = scmp.ne.s32.totalorder %s60_s18, %s616_s19  ;;  %p622_p3 = scmp.lt.s32.totalorder %s616_s19, %s616_s19 }
  0x28   :  { %p623_p4 = por %p622_p3, %p621_p2 }
  0x2a   :  { %p624_p5 = pnand %p623_p4, %p617_p1 }
  0x2c   :  { %627 = shalt.err (!%p624_p5)
}
  0x2d   :  { %65 = dma.hbm_to_vmem [thread:$0]  %s797_s5, 2048, %s60_s18, [#allocation9], %s657_s27, %s657_s27, %s658_s28  }
  0x2e   :  { %648 = dma.done.wait [#allocation3], 128  }
  0x2f   :  { %649 = vsyncadd [#allocation3], 4294967168 }
  0x30   :  { %650 = dma.done.wait [#allocation6], 4096  }
  0x31   :  { %651 = vsyncadd [#allocation6], 4294963200 }
  0x32   :  { %652 = dma.done.wait [#allocation9], 2048  }
  0x33   :  { %653 = vsyncadd [#allocation9], 4294965248  ;;  %v662_v0 = vmov 0.0   ;;  %vm663_vm0 = vmmov 0   ;;  %v96_v1 = vld [vmem:[#allocation5 + $0x78] sm:$0xff]  ;;  %v95_v2 = vld [vmem:[#allocation5 + $0x70] sm:$0xff] }
  0x34   :  { %434 = vmatprep.subr.mxu0 %v662_v0  ;;  %466 = vmatprep.mubr.msk.f32.mxu0 %vm663_vm0, %v662_v0  ;;  %v94_v3 = vld [vmem:[#allocation5 + $0x68] sm:$0xff]  ;;  %v93_v4 = vld [vmem:[#allocation5 + $0x60] sm:$0xff]  ;;  %v190_v5 = vld [vmem:[#allocation7 + $0x78] sm:$0xff]  ;;  %s664_s24 = smov [#allocation10]  }
  0x35   :  { %469 = vmatprep.subr.mxu1 %v662_v0  ;;  %501 = vmatprep.mubr.msk.f32.mxu1 %vm663_vm0, %v662_v0  ;;  %v92_v6 = vld [vmem:[#allocation5 + $0x58] sm:$0xff]  ;;  %v189_v7 = vld [vmem:[#allocation7 + $0x70] sm:$0xff]  ;;  %v188_v8 = vld [vmem:[#allocation7 + $0x68] sm:$0xff]  ;;  %s369_s25 = sshll.u32 %s664_s24, 4  ;;  %s370_s25 = int_to_ptr.vmem [resolvable:$true] %s369_s25 }
  0x36   :  { %435 = vmatpush3.msra.mxu0 %v96_v1  ;;  %470 = vmatpush3.msra.mxu1 %v190_v5  ;;  %v91_v9 = vld [vmem:[#allocation5 + $0x50] sm:$0xff]  ;;  %v187_v10 = vld [vmem:[#allocation7 + $0x60] sm:$0xff]  ;;  %v90_v11 = vld [vmem:[#allocation5 + $0x48] sm:$0xff]  ;;  %s628_s26 = scalar_lea.vmem %s370_s25, 128  ;;  %p633_p7 = scmp.lt.s32.totalorder %s370_s25, %s370_s25 }
  0x37   :  { %436 = vmatprep.subr.mxu0 %v662_v0  ;;  %471 = vmatprep.subr.mxu1 %v662_v0  ;;  %v186_v12 = vld [vmem:[#allocation7 + $0x58] sm:$0xff]  ;;  %v89_v13 = vld [vmem:[#allocation5 + $0x40] sm:$0xff]  ;;  %v185_v14 = vld [vmem:[#allocation7 + $0x50] sm:$0xff]  ;;  %p629_p6 = scmp.ne.s32.totalorder %s370_s25, %s628_s26  ;;  %p634_p8 = scmp.lt.s32.totalorder %s628_s26, %s628_s26 }
  0x38   :  { %437 = vmatpush3.msra.mxu0 %v95_v2  ;;  %472 = vmatpush3.msra.mxu1 %v189_v7  ;;  %v88_v15 = vld [vmem:[#allocation5 + $0x38] sm:$0xff]  ;;  %v184_v16 = vld [vmem:[#allocation7 + $0x48] sm:$0xff]  ;;  %v87_v17 = vld [vmem:[#allocation5 + $0x30] sm:$0xff] }
  0x39   :  { %438 = vmatprep.subr.mxu0 %v662_v0  ;;  %473 = vmatprep.subr.mxu1 %v662_v0  ;;  %v183_v18 = vld [vmem:[#allocation7 + $0x40] sm:$0xff]  ;;  %v86_v19 = vld [vmem:[#allocation5 + $0x28] sm:$0xff]  ;;  %v182_v20 = vld [vmem:[#allocation7 + $0x38] sm:$0xff]  ;;  %p635_p9 = por %p634_p8, %p633_p7 }
  0x3a   :  { %439 = vmatpush3.msra.mxu0 %v94_v3  ;;  %474 = vmatpush3.msra.mxu1 %v188_v8  ;;  %v85_v21 = vld [vmem:[#allocation5 + $0x20] sm:$0xff]  ;;  %v181_v22 = vld [vmem:[#allocation7 + $0x30] sm:$0xff]  ;;  %v84_v23 = vld [vmem:[#allocation5 + $0x18] sm:$0xff] }
  0x3b   :  { %440 = vmatprep.subr.mxu0 %v662_v0  ;;  %475 = vmatprep.subr.mxu1 %v662_v0  ;;  %v180_v24 = vld [vmem:[#allocation7 + $0x28] sm:$0xff]  ;;  %v83_v25 = vld [vmem:[#allocation5 + $0x10] sm:$0xff]  ;;  %v179_v26 = vld [vmem:[#allocation7 + $0x20] sm:$0xff]  ;;  %p636_p10 = pnand %p635_p9, %p629_p6 }
  0x3c   :  { %441 = vmatpush3.msra.mxu0 %v93_v4  ;;  %476 = vmatpush3.msra.mxu1 %v187_v10  ;;  %v82_v27 = vld [vmem:[#allocation5 + $0x8] sm:$0xff]  ;;  %v178_v28 = vld [vmem:[#allocation7 + $0x18] sm:$0xff]  ;;  %v81_v29 = vld [vmem:[#allocation5] sm:$0xff] }
  0x3d   :  { %442 = vmatprep.subr.mxu0 %v662_v0  ;;  %477 = vmatprep.subr.mxu1 %v662_v0  ;;  %v80_v30 = vld [vmem:[#allocation2] sm:$0xff]  ;;  %v177_v31 = vld [vmem:[#allocation7 + $0x10] sm:$0xff]  ;;  %v176_v32 = vld [vmem:[#allocation7 + $0x8] sm:$0xff] }
  0x3e   :  { %443 = vmatpush3.msra.mxu0 %v92_v6  ;;  %478 = vmatpush3.msra.mxu1 %v186_v12  ;;  %v175_v33 = vld [vmem:[#allocation7] sm:$0xff]  ;;  %v284_v34 = vld [vmem:[#allocation8 + $0x78] sm:$0xff]  ;;  %v283_v35 = vld [vmem:[#allocation8 + $0x70] sm:$0xff] }
  0x3f   :  { %444 = vmatprep.subr.mxu0 %v662_v0  ;;  %479 = vmatprep.subr.mxu1 %v662_v0  ;;  %v282_v36 = vld [vmem:[#allocation8 + $0x68] sm:$0xff]  ;;  %v281_v37 = vld [vmem:[#allocation8 + $0x60] sm:$0xff]  ;;  %v280_v38 = vld [vmem:[#allocation8 + $0x58] sm:$0xff] }
  0x40   :  { %445 = vmatpush3.msra.mxu0 %v91_v9  ;;  %480 = vmatpush3.msra.mxu1 %v185_v14  ;;  %v279_v39 = vld [vmem:[#allocation8 + $0x50] sm:$0xff]  ;;  %v278_v40 = vld [vmem:[#allocation8 + $0x48] sm:$0xff]  ;;  %v277_v41 = vld [vmem:[#allocation8 + $0x40] sm:$0xff] }
  0x41   :  { %446 = vmatprep.subr.mxu0 %v662_v0  ;;  %481 = vmatprep.subr.mxu1 %v662_v0  ;;  %v276_v42 = vld [vmem:[#allocation8 + $0x38] sm:$0xff]  ;;  %v275_v43 = vld [vmem:[#allocation8 + $0x30] sm:$0xff]  ;;  %v274_v44 = vld [vmem:[#allocation8 + $0x28] sm:$0xff] }
  0x42   :  { %447 = vmatpush3.msra.mxu0 %v90_v11  ;;  %482 = vmatpush3.msra.mxu1 %v184_v16  ;;  %v273_v45 = vld [vmem:[#allocation8 + $0x20] sm:$0xff]  ;;  %v272_v46 = vld [vmem:[#allocation8 + $0x18] sm:$0xff]  ;;  %v271_v52 = vld [vmem:[#allocation8 + $0x10] sm:$0xff] }
  0x43   :  { %448 = vmatprep.subr.mxu0 %v662_v0  ;;  %483 = vmatprep.subr.mxu1 %v662_v0  ;;  %v380_v47 = vld [vmem:[%s794_s2] ss:$0 sm:$0xff]  ;;  %v270_v53 = vld [vmem:[#allocation8 + $0x8] sm:$0xff]  ;;  %v269_v54 = vld [vmem:[#allocation8] sm:$0xff] }
  0x44   :  { %449 = vmatpush3.msra.mxu0 %v89_v13  ;;  %484 = vmatpush3.msra.mxu1 %v183_v18  ;;  %v381_v55 = vld [vmem:[%s796_s4] ss:$0 sm:$0xff] }
  0x45   :  { %450 = vmatprep.subr.mxu0 %v662_v0  ;;  %485 = vmatprep.subr.mxu1 %v662_v0  ;;  %v382_v60 = vld [vmem:[%s798_s6] ss:$0 sm:$0xff] }
  0x46   :  { %451 = vmatpush3.msra.mxu0 %v88_v15  ;;  %486 = vmatpush3.msra.mxu1 %v182_v20 }
  0x47   :  { %452 = vmatprep.subr.mxu0 %v662_v0  ;;  %487 = vmatprep.subr.mxu1 %v662_v0 }
  0x48   :  { %453 = vmatpush3.msra.mxu0 %v87_v17  ;;  %488 = vmatpush3.msra.mxu1 %v181_v22 }
  0x49   :  { %454 = vmatprep.subr.mxu0 %v662_v0  ;;  %489 = vmatprep.subr.mxu1 %v662_v0 }
  0x4a   :  { %455 = vmatpush3.msra.mxu0 %v86_v19  ;;  %490 = vmatpush3.msra.mxu1 %v180_v24 }
  0x4b   :  { %456 = vmatprep.subr.mxu0 %v662_v0  ;;  %491 = vmatprep.subr.mxu1 %v662_v0 }
  0x4c   :  { %457 = vmatpush3.msra.mxu0 %v85_v21  ;;  %492 = vmatpush3.msra.mxu1 %v179_v26 }
  0x4d   :  { %458 = vmatprep.subr.mxu0 %v662_v0  ;;  %493 = vmatprep.subr.mxu1 %v662_v0 }
  0x4e   :  { %459 = vmatpush3.msra.mxu0 %v84_v23  ;;  %494 = vmatpush3.msra.mxu1 %v178_v28 }
  0x4f   :  { %460 = vmatprep.subr.mxu0 %v662_v0  ;;  %495 = vmatprep.subr.mxu1 %v662_v0 }
  0x50   :  { %461 = vmatpush3.msra.mxu0 %v83_v25  ;;  %496 = vmatpush3.msra.mxu1 %v177_v31 }
  0x51   :  { %462 = vmatprep.subr.mxu0 %v662_v0  ;;  %497 = vmatprep.subr.mxu1 %v662_v0 }
  0x52   :  { %463 = vmatpush3.msra.mxu0 %v82_v27  ;;  %498 = vmatpush3.msra.mxu1 %v176_v32 }
  0x53   :  { %464 = vmatprep.subr.mxu0 %v662_v0  ;;  %499 = vmatprep.subr.mxu1 %v662_v0 }
  0x54   :  { %465 = vmatpush3.msra.mxu0 %v81_v29  ;;  %500 = vmatpush3.msra.mxu1 %v175_v33 }
  0x55   :  { %467 = vmatmul.mubr.f32.vlgmr.msra.gmra.mxu0 %v80_v30  ;;  %504 = vmatprep.subr.mxu0 %v662_v0 }
  0x56   :  { %536 = vmatprep.mubr.msk.f32.mxu0 %vm663_vm0, %v662_v0  ;;  %505 = vmatpush3.msra.mxu0 %v284_v34 }
  0x57   :  { %506 = vmatprep.subr.mxu0 %v662_v0 }
  0x58   :  { %507 = vmatpush3.msra.mxu0 %v283_v35 }
  0x59   :  { %508 = vmatprep.subr.mxu0 %v662_v0 }
  0x5a   :  { %509 = vmatpush3.msra.mxu0 %v282_v36 }
  0x5b   :  { %510 = vmatprep.subr.mxu0 %v662_v0 }
  0x5c   :  { %511 = vmatpush3.msra.mxu0 %v281_v37 }
  0x5d   :  { %512 = vmatprep.subr.mxu0 %v662_v0 }
  0x5e   :  { %513 = vmatpush3.msra.mxu0 %v280_v38 }
  0x5f   :  { %514 = vmatprep.subr.mxu0 %v662_v0 }
  0x60   :  { %515 = vmatpush3.msra.mxu0 %v279_v39 }
  0x61   :  { %516 = vmatprep.subr.mxu0 %v662_v0 }
  0x62   :  { %517 = vmatpush3.msra.mxu0 %v278_v40 }
  0x63   :  { %518 = vmatprep.subr.mxu0 %v662_v0 }
  0x64   :  { %519 = vmatpush3.msra.mxu0 %v277_v41 }
  0x65   :  { %520 = vmatprep.subr.mxu0 %v662_v0 }
  0x66   :  { %521 = vmatpush3.msra.mxu0 %v276_v42 }
  0x67   :  { %522 = vmatprep.subr.mxu0 %v662_v0 }
  0x68   :  { %523 = vmatpush3.msra.mxu0 %v275_v43 }
  0x69   :  { %524 = vmatprep.subr.mxu0 %v662_v0 }
  0x6a   :  { %525 = vmatpush3.msra.mxu0 %v274_v44 }
  0x6b   :  { %526 = vmatprep.subr.mxu0 %v662_v0 }
  0x6c   :  { %527 = vmatpush3.msra.mxu0 %v273_v45 }
  0x6d   :  { %528 = vmatprep.subr.mxu0 %v662_v0 }
  0x6e   :  { %529 = vmatpush3.msra.mxu0 %v272_v46 }
  0x6f   :  { %530 = vmatprep.subr.mxu0 %v662_v0 }
  0x70   :  { %531 = vmatpush3.msra.mxu0 %v271_v52 }
  0x71   :  { %532 = vmatprep.subr.mxu0 %v662_v0 }
  0x72   :  { %533 = vmatpush3.msra.mxu0 %v270_v53 }
  0x73   :  { %534 = vmatprep.subr.mxu0 %v662_v0 }
  0x74   :  { %535 = vmatpush3.msra.mxu0 %v269_v54 }
 0x115   :  { %v170_v48 = vpop.f32.mrf.mxu0 }
 0x116   :  { %v171_v49 = vadd.f32 %v380_v47, %v170_v48 }
 0x117   :  { %v468_v50 = vpop.f32.mrf.mxu0 }
 0x118   :  { %v174_v51 = vmax.f32 %v171_v49, 0.0 }
 0x11a   :  { %502 = vmatmul.mubr.f32.vlgmr.msra.gmra.mxu1 %v174_v51 }
 0x1da   :  { %v264_v56 = vpop.f32.mrf.mxu1 }
 0x1db   :  { %v265_v57 = vadd.f32 %v381_v55, %v264_v56 }
 0x1dc   :  { %v503_v58 = vpop.f32.mrf.mxu1 }
 0x1dd   :  { %v268_v59 = vmax.f32 %v265_v57, 0.0 }
 0x1df   :  { %537 = vmatmul.mubr.f32.vlgmr.msra.gmra.mxu0 %v268_v59 }
 0x29f   :  { %v358_v61 = vpop.f32.mrf.mxu0 }
 0x2a0   :  { %v359_v62 = vadd.f32 %v382_v60, %v358_v61 }
 0x2a1   :  { %v538_v63 = vpop.f32.mrf.mxu0 }
 0x2a2   :  { %362 = vst [vmem:[#allocation10] sm:$0xff] %v359_v62 }
 0x2a3   :  { %639 = shalt.err (!%p636_p10)
}
 0x2a4   :  { %372 = dma.vmem_to_hbm [thread:$0]  %s370_s25, 128, %s799_s7, [#allocation4]  }
 0x2a5   :  { %654 = dma.done.wait [#allocation4], 128  }
 0x2a6   :  { %655 = vsyncadd [#allocation4], 4294967168 }
 0x2a7   :  { %376 = vsyncpa [#allocation3], 1 }
 0x2a8   :  { %377 = vsyncpa [#allocation6], 1 }
 0x2a9   :  { %378 = vsyncpa [#allocation9], 1 }
 0x2aa   :  { %379 = vsyncpa [#allocation4], 1 }

</bundles_post_ra>
